<compile_context>
chip_gen: v6e
topology: v6e:2x2x1
jax: 0.10.0
libtpu: 0.0.40
codegen_flags: <defaults>
</compile_context>

<pallas_src>
import functools

import jax
import jax.numpy as jnp
from jax import lax
from jax.experimental import pallas as pl
from jax.experimental.pallas import tpu as pltpu


def _round_up(x, m):
    return (x + m - 1) // m * m


def _pad2d(a, rows, cols):
    return jnp.pad(a, ((0, rows - a.shape[0]), (0, cols - a.shape[1])))


# ----------------------------------------------------------------------------------------
# Fused FeedForwardNetwork:  out = relu(x @ W1 + b1) @ W2 + b2     (dropout = identity)
# Grid: (token tiles [parallel], hidden-dim tiles [arbitrary reduction]).
# ----------------------------------------------------------------------------------------
def ffn_kernel(x_ref, w1_ref, b1_ref, w2_ref, b2_ref, o_ref, acc_ref):
    k = pl.program_id(1)

    @pl.when(k == 0)
    def _():
        acc_ref[...] = jnp.zeros_like(acc_ref)

    # inner linear (ColumnParallelLinear) on this hidden tile; bias + ReLU kept in f32.
    h = jnp.dot(x_ref[...], w1_ref[...], preferred_element_type=jnp.float32)
    h = jnp.maximum(h + b1_ref[...], 0.0)
    # Deliberate bf16 cast of the activations feeding the second MXU matmul (f32 accumulate).
    acc_ref[...] += jnp.dot(h.astype(jnp.bfloat16), w2_ref[...],
                            preferred_element_type=jnp.float32)

    @pl.when(k == pl.num_programs(1) - 1)
    def _():
        o_ref[...] = (acc_ref[...] + b2_ref[...]).astype(o_ref.dtype)


def _ffn_vmem_bytes(tm, tk, Dp):
    # double-buffered x / W1 / W2 / out tiles + resident f32 accumulator
    return 2 * (tm * Dp * 2 + Dp * tk * 2 + tk * Dp * 2 + tm * Dp * 4) + tm * Dp * 4


def ffn_forward(x, w1, b1, w2, b2, *, tm=None, tk=None,
                vmem_budget_bytes=24 * 1024 * 1024):
    """x: [M, D]; w1: [D, H]; b1: [H]; w2: [H, D]; b2: [D]  ->  [M, D] f32."""
    M, D = x.shape
    H = w1.shape[1]
    Dp = _round_up(D, 128)            # lane-dense feature dim (unmasked vst)
    Hp = _round_up(H, 128)

    # Token tile: large enough to fill the MXU, without over-padding tiny token counts.
    if tm is None:
        tm = min(256, _round_up(M, 8))
    # Hidden tile: largest 128-multiple divisor of Hp whose working set fits the VMEM budget
    # (keeps the kernel safe on v7x's 64 MiB VMEM; weights stream instead of sitting resident).
    cands = [c for c in (512, 384, 256, 128) if c <= Hp and Hp % c == 0]
    if tk is None:
        tk = next((c for c in cands if _ffn_vmem_bytes(tm, c, Dp) <= vmem_budget_bytes),
                  cands[-1])
    while tm > 8 and _ffn_vmem_bytes(tm, tk, Dp) > vmem_budget_bytes:
        tm = max(8, (tm // 2) // 8 * 8)
    Mp = _round_up(M, tm)

    x_p = _pad2d(x, Mp, Dp).astype(jnp.bfloat16)
    w1_p = _pad2d(w1, Dp, Hp).astype(jnp.bfloat16)
    w2_p = _pad2d(w2, Hp, Dp).astype(jnp.bfloat16)
    b1_p = _pad2d(b1.reshape(1, H).astype(jnp.float32), 1, Hp)
    b2_p = _pad2d(b2.reshape(1, D).astype(jnp.float32), 1, Dp)

    cost = pl.CostEstimate(
        flops=4 * Mp * Dp * Hp,
        transcendentals=0,
        bytes_accessed=(x_p.size * 2 + w1_p.size * 2 + w2_p.size * 2
                        + b1_p.size * 4 + b2_p.size * 4 + Mp * Dp * 4),
    )

    out = pl.pallas_call(
        ffn_kernel,
        out_shape=jax.ShapeDtypeStruct((Mp, Dp), jnp.float32),
        grid_spec=pltpu.PrefetchScalarGridSpec(
            num_scalar_prefetch=0,
            grid=(Mp // tm, Hp // tk),
            in_specs=[
                pl.BlockSpec((tm, Dp), lambda i, k: (i, 0)),   # x tile
                pl.BlockSpec((Dp, tk), lambda i, k: (0, k)),   # W1 column tile (streamed)
                pl.BlockSpec((1, tk), lambda i, k: (0, k)),    # b1 tile
                pl.BlockSpec((tk, Dp), lambda i, k: (k, 0)),   # W2 row tile (streamed)
                pl.BlockSpec((1, Dp), lambda i, k: (0, 0)),    # b2
            ],
            out_specs=pl.BlockSpec((tm, Dp), lambda i, k: (i, 0)),
            scratch_shapes=[pltpu.VMEM((tm, Dp), jnp.float32)],
        ),
        compiler_params=pltpu.CompilerParams(
            dimension_semantics=("parallel", "arbitrary")),
        cost_estimate=cost,
    )(x_p, w1_p, b1_p, w2_p, b2_p)
    return out[:M, :D]


# ----------------------------------------------------------------------------------------
# Generic linear:  out = x @ W + b      (used for the attention in_proj / out_proj)
# ----------------------------------------------------------------------------------------
def linear_kernel(x_ref, w_ref, b_ref, o_ref):
    acc = jnp.dot(x_ref[...], w_ref[...], preferred_element_type=jnp.float32)
    o_ref[...] = (acc + b_ref[...]).astype(o_ref.dtype)


def linear_forward(x, w, b, *, tm=None, tn=None):
    """x: [M, K]; w: [K, N]; b: [N]  ->  [M, N] f32."""
    M, K = x.shape
    N = w.shape[1]
    Kp = _round_up(K, 128)
    Np = _round_up(N, 128)
    if tm is None:
        tm = min(256, _round_up(M, 8))
    Mp = _round_up(M, tm)
    if tn is None:
        tn = next(c for c in (512, 384, 256, 128) if c <= Np and Np % c == 0)

    x_p = _pad2d(x, Mp, Kp).astype(jnp.bfloat16)
    w_p = _pad2d(w, Kp, Np).astype(jnp.bfloat16)
    b_p = _pad2d(b.reshape(1, N).astype(jnp.float32), 1, Np)

    # TODO(synk): very large K would want the same streamed-reduction treatment as the FFN;
    # here K == embed_dim, which comfortably fits VMEM.
    out = pl.pallas_call(
        linear_kernel,
        out_shape=jax.ShapeDtypeStruct((Mp, Np), jnp.float32),
        grid_spec=pltpu.PrefetchScalarGridSpec(
            num_scalar_prefetch=0,
            grid=(Mp // tm, Np // tn),
            in_specs=[
                pl.BlockSpec((tm, Kp), lambda i, j: (i, 0)),
                pl.BlockSpec((Kp, tn), lambda i, j: (0, j)),
                pl.BlockSpec((1, tn), lambda i, j: (0, j)),
            ],
            out_specs=pl.BlockSpec((tm, tn), lambda i, j: (i, j)),
        ),
        compiler_params=pltpu.CompilerParams(
            dimension_semantics=("parallel", "parallel")),
    )(x_p, w_p, b_p)
    return out[:M, :N]


# ----------------------------------------------------------------------------------------
# LayerNorm over the feature dim (kept un-padded so the statistics are exact).
# ----------------------------------------------------------------------------------------
def layernorm_kernel(x_ref, g_ref, b_ref, o_ref, *, eps):
    x = x_ref[...]
    mu = jnp.mean(x, axis=-1, keepdims=True)
    var = jnp.mean(jnp.square(x - mu), axis=-1, keepdims=True)
    inv = lax.rsqrt(var + eps)
    o_ref[...] = ((x - mu) * inv * g_ref[...] + b_ref[...]).astype(o_ref.dtype)


def layernorm_forward(x, gamma, beta, *, eps=1e-5, tm=None):
    M, D = x.shape
    if tm is None:
        tm = min(256, _round_up(M, 8))
    Mp = _round_up(M, tm)
    x_p = jnp.pad(x, ((0, Mp - M), (0, 0)))
    g = gamma.reshape(1, D).astype(jnp.float32)
    b = beta.reshape(1, D).astype(jnp.float32)
    out = pl.pallas_call(
        functools.partial(layernorm_kernel, eps=eps),
        out_shape=jax.ShapeDtypeStruct((Mp, D), jnp.float32),
        grid_spec=pltpu.PrefetchScalarGridSpec(
            num_scalar_prefetch=0,
            grid=(Mp // tm,),
            in_specs=[
                pl.BlockSpec((tm, D), lambda i: (i, 0)),
                pl.BlockSpec((1, D), lambda i: (0, 0)),
                pl.BlockSpec((1, D), lambda i: (0, 0)),
            ],
            out_specs=pl.BlockSpec((tm, D), lambda i: (i, 0)),
        ),
        compiler_params=pltpu.CompilerParams(dimension_semantics=("parallel",)),
    )(x_p, g, b)
    return out[:M]


# ----------------------------------------------------------------------------------------
# Scaled dot-product attention core, one (batch, head) slice per grid step.
# ----------------------------------------------------------------------------------------
def attention_kernel(q_ref, k_ref, v_ref, o_ref, *, scale):
    q = q_ref[...][0]
    k = k_ref[...][0]
    v = v_ref[...][0]
    s = jnp.dot(q, k.T, preferred_element_type=jnp.float32) * scale
    # TODO(synk): additive attn_mask / kv_cache paths not wired in (demo runs mask=None, no cache).
    m = jnp.max(s, axis=-1, keepdims=True)
    p = jnp.exp(s - m)
    p = p / jnp.sum(p, axis=-1, keepdims=True)
    o = jnp.dot(p.astype(jnp.bfloat16), v, preferred_element_type=jnp.float32)
    o_ref[...] = o[None].astype(o_ref.dtype)


def attention_forward(q, k, v, *, scale):
    """q, k, v: [B*heads, S, Dh] -> softmax(q k^T * scale) v."""
    BH, S, Dh = q.shape
    qb = q.astype(jnp.bfloat16)
    kb = k.astype(jnp.bfloat16)
    vb = v.astype(jnp.bfloat16)
    return pl.pallas_call(
        functools.partial(attention_kernel, scale=scale),
        out_shape=jax.ShapeDtypeStruct((BH, S, Dh), jnp.float32),
        grid_spec=pltpu.PrefetchScalarGridSpec(
            num_scalar_prefetch=0,
            grid=(BH,),
            in_specs=[
                pl.BlockSpec((1, S, Dh), lambda i: (i, 0, 0)),
                pl.BlockSpec((1, S, Dh), lambda i: (i, 0, 0)),
                pl.BlockSpec((1, S, Dh), lambda i: (i, 0, 0)),
            ],
            out_specs=pl.BlockSpec((1, S, Dh), lambda i: (i, 0, 0)),
        ),
        compiler_params=pltpu.CompilerParams(dimension_semantics=("parallel",)),
    )(qb, kb, vb)


# ----------------------------------------------------------------------------------------
# Full TransformerEncoder forward (eval mode: dropout == identity).
# ----------------------------------------------------------------------------------------
def encoder_forward(x, params, *, heads):
    B, S, D = x.shape
    Dh = D // heads
    scale = 1.0 / (Dh ** 0.5)
    h = x.reshape(B * S, D).astype(jnp.float32)
    for lyr in params["layers"]:
        # --- self-attention sub-block ---
        y = layernorm_forward(h, lyr["ln1_g"], lyr["ln1_b"])
        qkv = linear_forward(y, lyr["wqkv"], lyr["bqkv"])                 # in_proj: [M, 3D]
        qkv = qkv.reshape(B, S, 3 * heads, Dh).transpose(0, 2, 1, 3)      # split_heads(., 3*heads)
        q, k, v = jnp.split(qkv, 3, axis=1)                               # each [B, heads, S, Dh]
        attn = attention_forward(q.reshape(B * heads, S, Dh),
                                 k.reshape(B * heads, S, Dh),
                                 v.reshape(B * heads, S, Dh), scale=scale)
        attn = attn.reshape(B, heads, S, Dh).transpose(0, 2, 1, 3)        # combine_heads
        attn = linear_forward(attn.reshape(B * S, D), lyr["wo"], lyr["bo"])  # out_proj
        h = h + attn                                                      # dropout (eval) = id
        # --- FFN sub-block ---
        y = layernorm_forward(h, lyr["ln2_g"], lyr["ln2_b"])
        h = h + ffn_forward(y, lyr["w1"], lyr["b1"], lyr["w2"], lyr["b2"])
    h = layernorm_forward(h, params["lnf_g"], params["lnf_b"])
    return h.reshape(B, S, D)


def reference_forward(x, params, *, heads):
    """Pure-JAX f32 reference with identical semantics (eval mode)."""
    def ln(v, g, b, eps=1e-5):
        mu = jnp.mean(v, axis=-1, keepdims=True)
        var = jnp.mean(jnp.square(v - mu), axis=-1, keepdims=True)
        return (v - mu) * lax.rsqrt(var + eps) * g + b

    B, S, D = x.shape
    Dh = D // heads
    scale = 1.0 / (Dh ** 0.5)
    h = x.reshape(B * S, D)
    for lyr in params["layers"]:
        y = ln(h, lyr["ln1_g"], lyr["ln1_b"])
        qkv = (y @ lyr["wqkv"] + lyr["bqkv"]).reshape(B, S, 3 * heads, Dh).transpose(0, 2, 1, 3)
        q, k, v = jnp.split(qkv, 3, axis=1)
        s = jnp.einsum("bhqd,bhkd->bhqk", q, k) * scale
        p = jax.nn.softmax(s, axis=-1)
        o = jnp.einsum("bhqk,bhkd->bhqd", p, v).transpose(0, 2, 1, 3).reshape(B * S, D)
        h = h + (o @ lyr["wo"] + lyr["bo"])
        y = ln(h, lyr["ln2_g"], lyr["ln2_b"])
        h = h + (jnp.maximum(y @ lyr["w1"] + lyr["b1"], 0.0) @ lyr["w2"] + lyr["b2"])
    h = ln(h, params["lnf_g"], params["lnf_b"])
    return h.reshape(B, S, D)


def init_params(key, num_layers, embed_dim, ffn_dim):
    D, H = embed_dim, ffn_dim

    def nrm(k, shape):
        return 0.02 * jax.random.normal(k, shape, jnp.float32)

    keys = iter(jax.random.split(key, num_layers * 12 + 1))
    layers = []
    for _ in range(num_layers):
        layers.append({
            "ln1_g": 1.0 + nrm(next(keys), (D,)), "ln1_b": nrm(next(keys), (D,)),
            # PyTorch Linear stores [out, in]; transpose once so kernels do x @ W.
            "wqkv": nrm(next(keys), (3 * D, D)).T, "bqkv": nrm(next(keys), (3 * D,)),
            "wo": nrm(next(keys), (D, D)).T, "bo": nrm(next(keys), (D,)),
            "ln2_g": 1.0 + nrm(next(keys), (D,)), "ln2_b": nrm(next(keys), (D,)),
            "w1": nrm(next(keys), (H, D)).T, "b1": nrm(next(keys), (H,)),
            "w2": nrm(next(keys), (D, H)).T, "b2": nrm(next(keys), (D,)),
        })
    return {"layers": layers,
            "lnf_g": jnp.ones((D,), jnp.float32),
            "lnf_b": jnp.zeros((D,), jnp.float32)}


if __name__ == "__main__":
    batch, seq = 2, 8
    embed_dim, ffn_dim, attention_heads, num_layers = 32, 64, 4, 2
    dropout_p = 0.1  # eval mode => identity

    root = jax.random.PRNGKey(0)
    kx, kp = jax.random.split(root)
    x = jax.random.normal(kx, (batch, seq, embed_dim), dtype=jnp.float32)
    params = init_params(kp, num_layers, embed_dim, ffn_dim)

    fwd = jax.jit(functools.partial(encoder_forward, heads=attention_heads))
    out = fwd(x, params)
    jax.block_until_ready(out)

    ref = reference_forward(x, params, heads=attention_heads)
    assert out.shape == ref.shape
    # bf16 MXU inputs with f32 accumulation => tolerance is loosened vs the all-f32 reference.
    err = float(jnp.max(jnp.abs(out - ref)))
    assert jnp.allclose(out, ref, atol=2e-2, rtol=2e-2), f"mismatch vs reference, max abs err {err}"
    print("KERNEL_OK")
</pallas_src>

<mosaic_0001>
module attributes {stable_mosaic.version = 11 : i64} {
  func.func @layernorm_kernel(%arg0: i32, %arg1: memref<16x32xf32, #tpu.memory_space<vmem>>, %arg2: memref<1x32xf32, #tpu.memory_space<vmem>>, %arg3: memref<1x32xf32, #tpu.memory_space<vmem>>, %arg4: memref<16x32xf32, #tpu.memory_space<vmem>>) attributes {dimension_semantics = [#tpu.dimension_semantics<parallel>], iteration_bounds = array<i64: 1>, scalar_prefetch = 0 : i64, scratch_operands = 0 : i64, tpu.core_type = #tpu.core_type<tc>, window_params = [{transform_indices = @transform_0, window_bounds = array<i64: 16, 32>}, {pipeline_mode = #tpu.pipeline_mode<synchronous>, transform_indices = @transform_1, window_bounds = array<i64: 1, 32>}, {pipeline_mode = #tpu.pipeline_mode<synchronous>, transform_indices = @transform_2, window_bounds = array<i64: 1, 32>}, {transform_indices = @transform_3, window_bounds = array<i64: 16, 32>}]} {
    %c0 = arith.constant 0 : index
    %c0_0 = arith.constant 0 : index
    %0 = vector.load %arg1[%c0, %c0_0] : memref<16x32xf32, #tpu.memory_space<vmem>>, vector<16x32xf32>
    %cst = arith.constant dense<0.000000e+00> : vector<16xf32>
    %1 = vector.multi_reduction <add>, %0, %cst [1] : vector<16x32xf32> to vector<16xf32>
    %2 = vector.shape_cast %1 : vector<16xf32> to vector<16x1xf32>
    %cst_1 = arith.constant 3.200000e+01 : f32
    %3 = vector.broadcast %cst_1 : f32 to vector<16x1xf32>
    %4 = arith.divf %2, %3 : vector<16x1xf32>
    %5 = vector.broadcast %4 : vector<16x1xf32> to vector<16x32xf32>
    %6 = arith.subf %0, %5 : vector<16x32xf32>
    %7 = arith.mulf %6, %6 : vector<16x32xf32>
    %cst_2 = arith.constant dense<0.000000e+00> : vector<16xf32>
    %8 = vector.multi_reduction <add>, %7, %cst_2 [1] : vector<16x32xf32> to vector<16xf32>
    %9 = vector.shape_cast %8 : vector<16xf32> to vector<16x1xf32>
    %cst_3 = arith.constant 3.200000e+01 : f32
    %10 = vector.broadcast %cst_3 : f32 to vector<16x1xf32>
    %11 = arith.divf %9, %10 : vector<16x1xf32>
    %cst_4 = arith.constant 9.99999974E-6 : f32
    %12 = vector.broadcast %cst_4 : f32 to vector<16x1xf32>
    %13 = arith.addf %11, %12 : vector<16x1xf32>
    %14 = math.rsqrt %13 : vector<16x1xf32>
    %15 = vector.broadcast %4 : vector<16x1xf32> to vector<16x32xf32>
    %16 = arith.subf %0, %15 : vector<16x32xf32>
    %17 = vector.broadcast %14 : vector<16x1xf32> to vector<16x32xf32>
    %18 = arith.mulf %16, %17 : vector<16x32xf32>
    %c0_5 = arith.constant 0 : index
    %c0_6 = arith.constant 0 : index
    %19 = vector.load %arg2[%c0_5, %c0_6] : memref<1x32xf32, #tpu.memory_space<vmem>>, vector<1x32xf32>
    %20 = vector.broadcast %19 : vector<1x32xf32> to vector<16x32xf32>
    %21 = arith.mulf %18, %20 : vector<16x32xf32>
    %c0_7 = arith.constant 0 : index
    %c0_8 = arith.constant 0 : index
    %22 = vector.load %arg3[%c0_7, %c0_8] : memref<1x32xf32, #tpu.memory_space<vmem>>, vector<1x32xf32>
    %23 = vector.broadcast %22 : vector<1x32xf32> to vector<16x32xf32>
    %24 = arith.addf %21, %23 : vector<16x32xf32>
    %c0_9 = arith.constant 0 : index
    %c0_10 = arith.constant 0 : index
    %25 = vector.load %arg4[%c0_9, %c0_10] : memref<16x32xf32, #tpu.memory_space<vmem>>, vector<16x32xf32>
    tpu.vector_store %arg4[%c0_9, %c0_10], %24 {strides = array<i32>} : memref<16x32xf32, #tpu.memory_space<vmem>>, vector<16x32xf32>,
    return
  }
  func.func @transform_0(%arg0: i32) -> (i32, i32) {
    %c0_i32 = arith.constant 0 : i32
    %c0_i32_0 = arith.constant 0 : i32
    return %arg0, %c0_i32 : i32, i32
  }
  func.func @transform_1(%arg0: i32) -> (i32, i32) {
    %c0_i32 = arith.constant 0 : i32
    %c0_i32_0 = arith.constant 0 : i32
    %c0_i32_1 = arith.constant 0 : i32
    return %c0_i32, %c0_i32_0 : i32, i32
  }
  func.func @transform_2(%arg0: i32) -> (i32, i32) {
    %c0_i32 = arith.constant 0 : i32
    %c0_i32_0 = arith.constant 0 : i32
    %c0_i32_1 = arith.constant 0 : i32
    return %c0_i32, %c0_i32_0 : i32, i32
  }
  func.func @transform_3(%arg0: i32) -> (i32, i32) {
    %c0_i32 = arith.constant 0 : i32
    %c0_i32_0 = arith.constant 0 : i32
    return %arg0, %c0_i32 : i32, i32
  }
}

module attributes {stable_mosaic.version = 11 : i64} {
  func.func @linear_kernel(%arg0: i32, %arg1: i32, %arg2: memref<16x128xbf16, #tpu.memory_space<vmem>>, %arg3: memref<128x128xbf16, #tpu.memory_space<vmem>>, %arg4: memref<1x128xf32, #tpu.memory_space<vmem>>, %arg5: memref<16x128xf32, #tpu.memory_space<vmem>>) attributes {dimension_semantics = [#tpu.dimension_semantics<parallel>, #tpu.dimension_semantics<parallel>], iteration_bounds = array<i64: 1, 1>, scalar_prefetch = 0 : i64, scratch_operands = 0 : i64, tpu.core_type = #tpu.core_type<tc>, window_params = [{transform_indices = @transform_0, window_bounds = array<i64: 16, 128>}, {transform_indices = @transform_1, window_bounds = array<i64: 128, 128>}, {transform_indices = @transform_2, window_bounds = array<i64: 1, 128>}, {transform_indices = @transform_3, window_bounds = array<i64: 16, 128>}]} {
    %c0 = arith.constant 0 : index
    %c0_0 = arith.constant 0 : index
    %0 = vector.load %arg2[%c0, %c0_0] : memref<16x128xbf16, #tpu.memory_space<vmem>>, vector<16x128xbf16>
    %c0_1 = arith.constant 0 : index
    %c0_2 = arith.constant 0 : index
    %1 = vector.load %arg3[%c0_1, %c0_2] : memref<128x128xbf16, #tpu.memory_space<vmem>>, vector<128x128xbf16>
    %cst = arith.constant dense<0.000000e+00> : vector<16x128xf32>
    %2 = tpu.matmul %0, %1, %cst {dimension_numbers = #tpu.dot_dimension_numbers<[1], [0], [0], [1], [0, 0, 1, 1], [], []>} : vector<16x128xbf16>, vector<128x128xbf16>, vector<16x128xf32> -> vector<16x128xf32>
    %c0_3 = arith.constant 0 : index
    %c0_4 = arith.constant 0 : index
    %3 = vector.load %arg4[%c0_3, %c0_4] : memref<1x128xf32, #tpu.memory_space<vmem>>, vector<1x128xf32>
    %4 = vector.broadcast %3 : vector<1x128xf32> to vector<16x128xf32>
    %5 = arith.addf %2, %4 : vector<16x128xf32>
    %c0_5 = arith.constant 0 : index
    %c0_6 = arith.constant 0 : index
    %6 = vector.load %arg5[%c0_5, %c0_6] : memref<16x128xf32, #tpu.memory_space<vmem>>, vector<16x128xf32>
    tpu.vector_store %arg5[%c0_5, %c0_6], %5 {strides = array<i32>} : memref<16x128xf32, #tpu.memory_space<vmem>>, vector<16x128xf32>,
    return
  }
  func.func @transform_0(%arg0: i32, %arg1: i32) -> (i32, i32) {
    %c0_i32 = arith.constant 0 : i32
    %c0_i32_0 = arith.constant 0 : i32
    return %arg0, %c0_i32 : i32, i32
  }
  func.func @transform_1(%arg0: i32, %arg1: i32) -> (i32, i32) {
    %c0_i32 = arith.constant 0 : i32
    %c0_i32_0 = arith.constant 0 : i32
    return %c0_i32, %arg1 : i32, i32
  }
  func.func @transform_2(%arg0: i32, %arg1: i32) -> (i32, i32) {
    %c0_i32 = arith.constant 0 : i32
    %c0_i32_0 = arith.constant 0 : i32
    return %c0_i32, %arg1 : i32, i32
  }
  func.func @transform_3(%arg0: i32, %arg1: i32) -> (i32, i32) {
    %c0_i32 = arith.constant 0 : i32
    return %arg0, %arg1 : i32, i32
  }
}

module attributes {stable_mosaic.version = 11 : i64} {
  func.func @attention_kernel(%arg0: i32, %arg1: memref<1x8x8xbf16, #tpu.memory_space<vmem>>, %arg2: memref<1x8x8xbf16, #tpu.memory_space<vmem>>, %arg3: memref<1x8x8xbf16, #tpu.memory_space<vmem>>, %arg4: memref<1x8x8xf32, #tpu.memory_space<vmem>>) attributes {dimension_semantics = [#tpu.dimension_semantics<parallel>], iteration_bounds = array<i64: 8>, scalar_prefetch = 0 : i64, scratch_operands = 0 : i64, tpu.core_type = #tpu.core_type<tc>, window_params = [{transform_indices = @transform_0, window_bounds = array<i64: 1, 8, 8>}, {transform_indices = @transform_1, window_bounds = array<i64: 1, 8, 8>}, {transform_indices = @transform_2, window_bounds = array<i64: 1, 8, 8>}, {transform_indices = @transform_3, window_bounds = array<i64: 1, 8, 8>}]} {
    %c0 = arith.constant 0 : index
    %c0_0 = arith.constant 0 : index
    %c0_1 = arith.constant 0 : index
    %0 = vector.load %arg1[%c0, %c0_0, %c0_1] : memref<1x8x8xbf16, #tpu.memory_space<vmem>>, vector<1x8x8xbf16>
    %1 = vector.shape_cast %0 : vector<1x8x8xbf16> to vector<8x8xbf16>
    %c0_2 = arith.constant 0 : index
    %c0_3 = arith.constant 0 : index
    %c0_4 = arith.constant 0 : index
    %2 = vector.load %arg2[%c0_2, %c0_3, %c0_4] : memref<1x8x8xbf16, #tpu.memory_space<vmem>>, vector<1x8x8xbf16>
    %3 = vector.shape_cast %2 : vector<1x8x8xbf16> to vector<8x8xbf16>
    %c0_5 = arith.constant 0 : index
    %c0_6 = arith.constant 0 : index
    %c0_7 = arith.constant 0 : index
    %4 = vector.load %arg3[%c0_5, %c0_6, %c0_7] : memref<1x8x8xbf16, #tpu.memory_space<vmem>>, vector<1x8x8xbf16>
    %5 = vector.shape_cast %4 : vector<1x8x8xbf16> to vector<8x8xbf16>
    %6 = tpu.transpose %3, [1, 0] : vector<8x8xbf16> -> vector<8x8xbf16>
    %cst = arith.constant dense<0.000000e+00> : vector<8x8xf32>
    %7 = tpu.matmul %1, %6, %cst {dimension_numbers = #tpu.dot_dimension_numbers<[1], [0], [0], [1], [0, 0, 1, 1], [], []>} : vector<8x8xbf16>, vector<8x8xbf16>, vector<8x8xf32> -> vector<8x8xf32>
    %cst_8 = arith.constant 0.353553385 : f32
    %8 = vector.broadcast %cst_8 : f32 to vector<8x8xf32>
    %9 = arith.mulf %7, %8 : vector<8x8xf32>
    %cst_9 = arith.constant dense<0xFF800000> : vector<8xf32>
    %10 = vector.multi_reduction <maximumf>, %9, %cst_9 [1] : vector<8x8xf32> to vector<8xf32>
    %11 = vector.shape_cast %10 : vector<8xf32> to vector<8x1xf32>
    %12 = vector.broadcast %11 : vector<8x1xf32> to vector<8x8xf32>
    %13 = arith.subf %9, %12 : vector<8x8xf32>
    %14 = math.exp %13 : vector<8x8xf32>
    %cst_10 = arith.constant dense<0.000000e+00> : vector<8xf32>
    %15 = vector.multi_reduction <add>, %14, %cst_10 [1] : vector<8x8xf32> to vector<8xf32>
    %16 = vector.shape_cast %15 : vector<8xf32> to vector<8x1xf32>
    %17 = vector.broadcast %16 : vector<8x1xf32> to vector<8x8xf32>
    %18 = arith.divf %14, %17 : vector<8x8xf32>
    %19 = arith.truncf %18 : vector<8x8xf32> to vector<8x8xbf16>
    %cst_11 = arith.constant dense<0.000000e+00> : vector<8x8xf32>
    %20 = tpu.matmul %19, %5, %cst_11 {dimension_numbers = #tpu.dot_dimension_numbers<[1], [0], [0], [1], [0, 0, 1, 1], [], []>} : vector<8x8xbf16>, vector<8x8xbf16>, vector<8x8xf32> -> vector<8x8xf32>
    %21 = vector.shape_cast %20 : vector<8x8xf32> to vector<1x8x8xf32>
    %c0_12 = arith.constant 0 : index
    %c0_13 = arith.constant 0 : index
    %c0_14 = arith.constant 0 : index
    %22 = vector.load %arg4[%c0_12, %c0_13, %c0_14] : memref<1x8x8xf32, #tpu.memory_space<vmem>>, vector<1x8x8xf32>
    tpu.vector_store %arg4[%c0_12, %c0_13, %c0_14], %21 {strides = array<i32>} : memref<1x8x8xf32, #tpu.memory_space<vmem>>, vector<1x8x8xf32>,
    return
  }
  func.func @transform_0(%arg0: i32) -> (i32, i32, i32) {
    %c0_i32 = arith.constant 0 : i32
    %c0_i32_0 = arith.constant 0 : i32
    %c0_i32_1 = arith.constant 0 : i32
    return %arg0, %c0_i32, %c0_i32_0 : i32, i32, i32
  }
  func.func @transform_1(%arg0: i32) -> (i32, i32, i32) {
    %c0_i32 = arith.constant 0 : i32
    %c0_i32_0 = arith.constant 0 : i32
    %c0_i32_1 = arith.constant 0 : i32
    return %arg0, %c0_i32, %c0_i32_0 : i32, i32, i32
  }
  func.func @transform_2(%arg0: i32) -> (i32, i32, i32) {
    %c0_i32 = arith.constant 0 : i32
    %c0_i32_0 = arith.constant 0 : i32
    %c0_i32_1 = arith.constant 0 : i32
    return %arg0, %c0_i32, %c0_i32_0 : i32, i32, i32
  }
  func.func @transform_3(%arg0: i32) -> (i32, i32, i32) {
    %c0_i32 = arith.constant 0 : i32
    %c0_i32_0 = arith.constant 0 : i32
    %c0_i32_1 = arith.constant 0 : i32
    return %arg0, %c0_i32, %c0_i32_0 : i32, i32, i32
  }
}

module attributes {stable_mosaic.version = 11 : i64} {
  func.func @layernorm_kernel(%arg0: i32, %arg1: memref<16x32xf32, #tpu.memory_space<vmem>>, %arg2: memref<1x32xf32, #tpu.memory_space<vmem>>, %arg3: memref<1x32xf32, #tpu.memory_space<vmem>>, %arg4: memref<16x32xf32, #tpu.memory_space<vmem>>) attributes {dimension_semantics = [#tpu.dimension_semantics<parallel>], iteration_bounds = array<i64: 1>, scalar_prefetch = 0 : i64, scratch_operands = 0 : i64, tpu.core_type = #tpu.core_type<tc>, window_params = [{transform_indices = @transform_0, window_bounds = array<i64: 16, 32>}, {pipeline_mode = #tpu.pipeline_mode<synchronous>, transform_indices = @transform_1, window_bounds = array<i64: 1, 32>}, {pipeline_mode = #tpu.pipeline_mode<synchronous>, transform_indices = @transform_2, window_bounds = array<i64: 1, 32>}, {transform_indices = @transform_3, window_bounds = array<i64: 16, 32>}]} {
    %c0 = arith.constant 0 : index
    %c0_0 = arith.constant 0 : index
    %0 = vector.load %arg1[%c0, %c0_0] : memref<16x32xf32, #tpu.memory_space<vmem>>, vector<16x32xf32>
    %cst = arith.constant dense<0.000000e+00> : vector<16xf32>
    %1 = vector.multi_reduction <add>, %0, %cst [1] : vector<16x32xf32> to vector<16xf32>
    %2 = vector.shape_cast %1 : vector<16xf32> to vector<16x1xf32>
    %cst_1 = arith.constant 3.200000e+01 : f32
    %3 = vector.broadcast %cst_1 : f32 to vector<16x1xf32>
    %4 = arith.divf %2, %3 : vector<16x1xf32>
    %5 = vector.broadcast %4 : vector<16x1xf32> to vector<16x32xf32>
    %6 = arith.subf %0, %5 : vector<16x32xf32>
    %7 = arith.mulf %6, %6 : vector<16x32xf32>
    %cst_2 = arith.constant dense<0.000000e+00> : vector<16xf32>
    %8 = vector.multi_reduction <add>, %7, %cst_2 [1] : vector<16x32xf32> to vector<16xf32>
    %9 = vector.shape_cast %8 : vector<16xf32> to vector<16x1xf32>
    %cst_3 = arith.constant 3.200000e+01 : f32
    %10 = vector.broadcast %cst_3 : f32 to vector<16x1xf32>
    %11 = arith.divf %9, %10 : vector<16x1xf32>
    %cst_4 = arith.constant 9.99999974E-6 : f32
    %12 = vector.broadcast %cst_4 : f32 to vector<16x1xf32>
    %13 = arith.addf %11, %12 : vector<16x1xf32>
    %14 = math.rsqrt %13 : vector<16x1xf32>
    %15 = vector.broadcast %4 : vector<16x1xf32> to vector<16x32xf32>
    %16 = arith.subf %0, %15 : vector<16x32xf32>
    %17 = vector.broadcast %14 : vector<16x1xf32> to vector<16x32xf32>
    %18 = arith.mulf %16, %17 : vector<16x32xf32>
    %c0_5 = arith.constant 0 : index
    %c0_6 = arith.constant 0 : index
    %19 = vector.load %arg2[%c0_5, %c0_6] : memref<1x32xf32, #tpu.memory_space<vmem>>, vector<1x32xf32>
    %20 = vector.broadcast %19 : vector<1x32xf32> to vector<16x32xf32>
    %21 = arith.mulf %18, %20 : vector<16x32xf32>
    %c0_7 = arith.constant 0 : index
    %c0_8 = arith.constant 0 : index
    %22 = vector.load %arg3[%c0_7, %c0_8] : memref<1x32xf32, #tpu.memory_space<vmem>>, vector<1x32xf32>
    %23 = vector.broadcast %22 : vector<1x32xf32> to vector<16x32xf32>
    %24 = arith.addf %21, %23 : vector<16x32xf32>
    %c0_9 = arith.constant 0 : index
    %c0_10 = arith.constant 0 : index
    %25 = vector.load %arg4[%c0_9, %c0_10] : memref<16x32xf32, #tpu.memory_space<vmem>>, vector<16x32xf32>
    tpu.vector_store %arg4[%c0_9, %c0_10], %24 {strides = array<i32>} : memref<16x32xf32, #tpu.memory_space<vmem>>, vector<16x32xf32>,
    return
  }
  func.func @transform_0(%arg0: i32) -> (i32, i32) {
    %c0_i32 = arith.constant 0 : i32
    %c0_i32_0 = arith.constant 0 : i32
    return %arg0, %c0_i32 : i32, i32
  }
  func.func @transform_1(%arg0: i32) -> (i32, i32) {
    %c0_i32 = arith.constant 0 : i32
    %c0_i32_0 = arith.constant 0 : i32
    %c0_i32_1 = arith.constant 0 : i32
    return %c0_i32, %c0_i32_0 : i32, i32
  }
  func.func @transform_2(%arg0: i32) -> (i32, i32) {
    %c0_i32 = arith.constant 0 : i32
    %c0_i32_0 = arith.constant 0 : i32
    %c0_i32_1 = arith.constant 0 : i32
    return %c0_i32, %c0_i32_0 : i32, i32
  }
  func.func @transform_3(%arg0: i32) -> (i32, i32) {
    %c0_i32 = arith.constant 0 : i32
    %c0_i32_0 = arith.constant 0 : i32
    return %arg0, %c0_i32 : i32, i32
  }
}

module attributes {stable_mosaic.version = 11 : i64} {
  func.func @ffn_kernel(%arg0: i32, %arg1: i32, %arg2: memref<16x128xbf16, #tpu.memory_space<vmem>>, %arg3: memref<128x128xbf16, #tpu.memory_space<vmem>>, %arg4: memref<1x128xf32, #tpu.memory_space<vmem>>, %arg5: memref<128x128xbf16, #tpu.memory_space<vmem>>, %arg6: memref<1x128xf32, #tpu.memory_space<vmem>>, %arg7: memref<16x128xf32, #tpu.memory_space<vmem>>, %arg8: memref<16x128xf32, #tpu.memory_space<vmem>>) attributes {dimension_semantics = [#tpu.dimension_semantics<parallel>, #tpu.dimension_semantics<arbitrary>], iteration_bounds = array<i64: 1, 1>, scalar_prefetch = 0 : i64, scratch_operands = 1 : i64, tpu.core_type = #tpu.core_type<tc>, window_params = [{transform_indices = @transform_0, window_bounds = array<i64: 16, 128>}, {transform_indices = @transform_1, window_bounds = array<i64: 128, 128>}, {transform_indices = @transform_2, window_bounds = array<i64: 1, 128>}, {transform_indices = @transform_3, window_bounds = array<i64: 128, 128>}, {pipeline_mode = #tpu.pipeline_mode<synchronous>, transform_indices = @transform_4, window_bounds = array<i64: 1, 128>}, {transform_indices = @transform_5, window_bounds = array<i64: 16, 128>}]} {
    %c0_i32 = arith.constant 0 : i32
    %0 = arith.cmpi eq, %arg1, %c0_i32 : i32
    %1 = arith.extui %0 : i1 to i32
    %c0_i32_0 = arith.constant 0 : i32
    %2 = arith.cmpi ne, %1, %c0_i32_0 : i32
    scf.if %2 {
      %cst_16 = arith.constant 0.000000e+00 : f32
      %20 = vector.broadcast %cst_16 : f32 to vector<16x128xf32>
      %c0_17 = arith.constant 0 : index
      %c0_18 = arith.constant 0 : index
      %21 = vector.load %arg8[%c0_17, %c0_18] : memref<16x128xf32, #tpu.memory_space<vmem>>, vector<16x128xf32>
      tpu.vector_store %arg8[%c0_17, %c0_18], %20 {strides = array<i32>} : memref<16x128xf32, #tpu.memory_space<vmem>>, vector<16x128xf32>,
    } else {
    }
    %c0 = arith.constant 0 : index
    %c0_1 = arith.constant 0 : index
    %3 = vector.load %arg2[%c0, %c0_1] : memref<16x128xbf16, #tpu.memory_space<vmem>>, vector<16x128xbf16>
    %c0_2 = arith.constant 0 : index
    %c0_3 = arith.constant 0 : index
    %4 = vector.load %arg3[%c0_2, %c0_3] : memref<128x128xbf16, #tpu.memory_space<vmem>>, vector<128x128xbf16>
    %cst = arith.constant dense<0.000000e+00> : vector<16x128xf32>
    %5 = tpu.matmul %3, %4, %cst {dimension_numbers = #tpu.dot_dimension_numbers<[1], [0], [0], [1], [0, 0, 1, 1], [], []>} : vector<16x128xbf16>, vector<128x128xbf16>, vector<16x128xf32> -> vector<16x128xf32>
    %c0_4 = arith.constant 0 : index
    %c0_5 = arith.constant 0 : index
    %6 = vector.load %arg4[%c0_4, %c0_5] : memref<1x128xf32, #tpu.memory_space<vmem>>, vector<1x128xf32>
    %7 = vector.broadcast %6 : vector<1x128xf32> to vector<16x128xf32>
    %8 = arith.addf %5, %7 : vector<16x128xf32>
    %cst_6 = arith.constant 0.000000e+00 : f32
    %9 = vector.broadcast %cst_6 : f32 to vector<16x128xf32>
    %10 = arith.maximumf %8, %9 : vector<16x128xf32>
    %c0_7 = arith.constant 0 : index
    %c0_8 = arith.constant 0 : index
    %11 = vector.load %arg8[%c0_7, %c0_8] : memref<16x128xf32, #tpu.memory_space<vmem>>, vector<16x128xf32>
    %12 = arith.truncf %10 : vector<16x128xf32> to vector<16x128xbf16>
    %c0_9 = arith.constant 0 : index
    %c0_10 = arith.constant 0 : index
    %13 = vector.load %arg5[%c0_9, %c0_10] : memref<128x128xbf16, #tpu.memory_space<vmem>>, vector<128x128xbf16>
    %cst_11 = arith.constant dense<0.000000e+00> : vector<16x128xf32>
    %14 = tpu.matmul %12, %13, %cst_11 {dimension_numbers = #tpu.dot_dimension_numbers<[1], [0], [0], [1], [0, 0, 1, 1], [], []>} : vector<16x128xbf16>, vector<128x128xbf16>, vector<16x128xf32> -> vector<16x128xf32>
    %15 = arith.addf %11, %14 : vector<16x128xf32>
    %c0_12 = arith.constant 0 : index
    %c0_13 = arith.constant 0 : index
    %16 = vector.load %arg8[%c0_12, %c0_13] : memref<16x128xf32, #tpu.memory_space<vmem>>, vector<16x128xf32>
    tpu.vector_store %arg8[%c0_12, %c0_13], %15 {strides = array<i32>} : memref<16x128xf32, #tpu.memory_space<vmem>>, vector<16x128xf32>,
    %c0_i32_14 = arith.constant 0 : i32
    %17 = arith.cmpi eq, %arg1, %c0_i32_14 : i32
    %18 = arith.extui %17 : i1 to i32
    %c0_i32_15 = arith.constant 0 : i32
    %19 = arith.cmpi ne, %18, %c0_i32_15 : i32
    scf.if %19 {
      %c0_16 = arith.constant 0 : index
      %c0_17 = arith.constant 0 : index
      %20 = vector.load %arg8[%c0_16, %c0_17] : memref<16x128xf32, #tpu.memory_space<vmem>>, vector<16x128xf32>
      %c0_18 = arith.constant 0 : index
      %c0_19 = arith.constant 0 : index
      %21 = vector.load %arg6[%c0_18, %c0_19] : memref<1x128xf32, #tpu.memory_space<vmem>>, vector<1x128xf32>
      %22 = vector.broadcast %21 : vector<1x128xf32> to vector<16x128xf32>
      %23 = arith.addf %20, %22 : vector<16x128xf32>
      %c0_20 = arith.constant 0 : index
      %c0_21 = arith.constant 0 : index
      %24 = vector.load %arg7[%c0_20, %c0_21] : memref<16x128xf32, #tpu.memory_space<vmem>>, vector<16x128xf32>
      tpu.vector_store %arg7[%c0_20, %c0_21], %23 {strides = array<i32>} : memref<16x128xf32, #tpu.memory_space<vmem>>, vector<16x128xf32>,
    } else {
    }
    return
  }
  func.func @transform_0(%arg0: i32, %arg1: i32) -> (i32, i32) {
    %c0_i32 = arith.constant 0 : i32
    %c0_i32_0 = arith.constant 0 : i32
    return %arg0, %c0_i32 : i32, i32
  }
  func.func @transform_1(%arg0: i32, %arg1: i32) -> (i32, i32) {
    %c0_i32 = arith.constant 0 : i32
    %c0_i32_0 = arith.constant 0 : i32
    return %c0_i32, %arg1 : i32, i32
  }
  func.func @transform_2(%arg0: i32, %arg1: i32) -> (i32, i32) {
    %c0_i32 = arith.constant 0 : i32
    %c0_i32_0 = arith.constant 0 : i32
    return %c0_i32, %arg1 : i32, i32
  }
  func.func @transform_3(%arg0: i32, %arg1: i32) -> (i32, i32) {
    %c0_i32 = arith.constant 0 : i32
    %c0_i32_0 = arith.constant 0 : i32
    return %arg1, %c0_i32 : i32, i32
  }
  func.func @transform_4(%arg0: i32, %arg1: i32) -> (i32, i32) {
    %c0_i32 = arith.constant 0 : i32
    %c0_i32_0 = arith.constant 0 : i32
    %c0_i32_1 = arith.constant 0 : i32
    return %c0_i32, %c0_i32_0 : i32, i32
  }
  func.func @transform_5(%arg0: i32, %arg1: i32) -> (i32, i32) {
    %c0_i32 = arith.constant 0 : i32
    %c0_i32_0 = arith.constant 0 : i32
    return %arg0, %c0_i32 : i32, i32
  }
}

</mosaic_0001>

<bundles_post_ra>
// kernel: encoder_forward.14
= control target key start
LH: loop header
LB: loop body
LE: loop exit
PB: predicated region body
PF: predicated region fallthrough
CT: control target
= control target key end

     0   :  { %v191_v0 = vmov 0.0   ;;  %vm192_vm0 = vmmov 0   ;;  %s249_s1 = inlined_call_operand.vmem [shape: bf16[128,128], index: 1, kind: input, shape index: {}]   ;;  %s250_s0 = inlined_call_operand.vmem [shape: bf16[16,128], index: 0, kind: input, shape index: {}]   ;;  %s251_s2 = inlined_call_operand.vmem [shape: f32[1,128], index: 2, kind: input, shape index: {}]   ;;  %s252_s3 = inlined_call_operand.vmem [shape: f32[16,128], index: 3, kind: output, shape index: {}]  }
   0x1   :  { %160 = vmatprep.subr.bf16.mxu0 %v191_v0  ;;  %v182_v1 = vld [vmem:[%s249_s1 + $0x38] sm:$0xff]   ;;  %176 = vmatprep.mubr.msk.bf16.mxu0 %vm192_vm0, %v191_v0  ;;  %v183_v2 = vld [vmem:[%s249_s1 + $0x30] sm:$0xff]   ;;  %v184_v3 = vld [vmem:[%s249_s1 + $0x28] sm:$0xff]  }
   0x2   :  { %161 = vmatpush3.bf16.msra.mxu0 %v182_v1  ;;  %v185_v4 = vld [vmem:[%s249_s1 + $0x20] sm:$0xff]   ;;  %v186_v5 = vld [vmem:[%s249_s1 + $0x18] sm:$0xff]   ;;  %v187_v6 = vld [vmem:[%s249_s1 + $0x10] sm:$0xff]  }
   0x3   :  { %162 = vmatprep.subr.bf16.mxu0 %v191_v0  ;;  %v188_v7 = vld [vmem:[%s249_s1 + $0x8] sm:$0xff]   ;;  %v189_v8 = vld [vmem:[%s249_s1] sm:$0xff]  }
   0x4   :  { %v190_v9 = vld [vmem:[%s250_s0] sm:$0xff]  }
   0x5   :  { %v141_v10 = vld [vmem:[%s251_s2] ss:$0 sm:$0xff] }
   0x6   :  { %163 = vmatpush3.bf16.msra.mxu0 %v183_v2 }
   0x7   :  { %164 = vmatprep.subr.bf16.mxu0 %v191_v0 }
   0xa   :  { %165 = vmatpush3.bf16.msra.mxu0 %v184_v3 }
   0xb   :  { %166 = vmatprep.subr.bf16.mxu0 %v191_v0 }
   0xe   :  { %167 = vmatpush3.bf16.msra.mxu0 %v185_v4 }
   0xf   :  { %168 = vmatprep.subr.bf16.mxu0 %v191_v0 }
  0x12   :  { %169 = vmatpush3.bf16.msra.mxu0 %v186_v5 }
  0x13   :  { %170 = vmatprep.subr.bf16.mxu0 %v191_v0 }
  0x16   :  { %171 = vmatpush3.bf16.msra.mxu0 %v187_v6 }
  0x17   :  { %172 = vmatprep.subr.bf16.mxu0 %v191_v0 }
  0x1a   :  { %173 = vmatpush3.bf16.msra.mxu0 %v188_v7 }
  0x1b   :  { %174 = vmatprep.subr.bf16.mxu0 %v191_v0 }
  0x1e   :  { %175 = vmatpush3.bf16.msra.mxu0 %v189_v8 }
  0x21   :  { %177 = vmatmul.mubr.bf16.vlgmr.msra.gmra.mxu0 %v190_v9 }
  0xe1   :  { %v128_v11 = vpop.f32.mrf.mxu0 }
  0xe2   :  { %v129_v12 = vadd.f32 %v141_v10, %v128_v11 }
  0xe3   :  { %v178_v13 = vpop.f32.mrf.mxu0 }
  0xe4   :  { %135 = vst [vmem:[%s252_s3] sm:$0xff] %v129_v12 }
  0xe5   :  { %v131_v14 = vpop.f32.mrf.mxu0 }
  0xe6   :  { %v132_v15 = vadd.f32 %v141_v10, %v131_v14 }
  0xe7   :  { %v179_v16 = vpop.f32.mrf.mxu0 }
  0xe8   :  { %136 = vst [vmem:[%s252_s3 + $0x8] sm:$0xff] %v132_v15 }

// kernel: encoder_forward.13
= control target key start
LH: loop header
LB: loop body
LE: loop exit
PB: predicated region body
PF: predicated region fallthrough
CT: control target
= control target key end

     0   :  { %vm16_vm0 = vcmask 261120   ;;  %s118_s0 = inlined_call_operand.vmem [shape: f32[16,32], index: 0, kind: input, shape index: {}]   ;;  %s119_s1 = inlined_call_operand.vmem [shape: f32[1,32], index: 1, kind: input, shape index: {}]   ;;  %s120_s2 = inlined_call_operand.vmem [shape: f32[1,32], index: 2, kind: input, shape index: {}]   ;;  %s121_s3 = inlined_call_operand.vmem [shape: f32[16,32], index: 3, kind: output, shape index: {}]  }
   0x1   :  { %v14_v0 = vld [vmem:[%s118_s0] sm:$0xff]  ;;  %v15_v1 = vld [vmem:[%s118_s0 + $0x8] sm:$0xff] }
   0x2   :  { %v17_v2 = vsel %vm16_vm0, %v14_v0, 0.0  ;;  %v20_v3 = vsel %vm16_vm0, %v15_v1, 0.0  ;;  %v68_v21 = vld [vmem:[%s119_s1] ss:$0 sm:$0xff] }
   0x3   :  { %18 = vadd.xlane.f32.xlu0 %v17_v2  ;;  %v69_v23 = vld [vmem:[%s120_s2] ss:$0 sm:$0xff] }
   0x7   :  { %21 = vadd.xlane.f32.xlu0 %v20_v3 }
  0x8c   :  { %v19_v4 = vpop.xlane.xlu0 %18 }
  0x8d   :  { %v24_v5 = vmul.f32 0.03125, %v19_v4 }
  0x8f   :  { %v26_v6 = vsub.f32 %v14_v0, %v24_v5 }
  0x90   :  { %v22_v7 = vpop.xlane.xlu0 %21 }
  0x91   :  { %v25_v8 = vmul.f32 0.03125, %v22_v7  ;;  %v28_v9 = vmul.f32 %v26_v6, %v26_v6 }
  0x93   :  { %v27_v10 = vsub.f32 %v15_v1, %v25_v8  ;;  %v30_v11 = vsel %vm16_vm0, %v28_v9, 0.0 }
  0x94   :  { %31 = vadd.xlane.f32.xlu1 %v30_v11 }
  0x95   :  { %v29_v12 = vmul.f32 %v27_v10, %v27_v10 }
  0x97   :  { %v33_v13 = vsel %vm16_vm0, %v29_v12, 0.0 }
  0x98   :  { %34 = vadd.xlane.f32.xlu1 %v33_v13 }
 0x11d   :  { %v32_v14 = vpop.xlane.xlu1 %31 }
 0x11e   :  { %v36_v15 = vmul.f32 0.03125, %v32_v14 }
 0x120   :  { %v38_v16 = vadd.f32 1e-05, %v36_v15 }
 0x121   :  { %v35_v17 = vpop.xlane.xlu1 %34 }
 0x122   :  { %70 = vrsqrt.f32 %v38_v16  ;;  %v37_v18 = vmul.f32 0.03125, %v35_v17 }
 0x124   :  { %v39_v19 = vadd.f32 1e-05, %v37_v18 }
 0x126   :  { %72 = vrsqrt.f32 %v39_v19 }
 0x12f   :  { %v71_v20 = vpop.eup %70 }
 0x130   :  { %v42_v22 = vmul.f32 %v71_v20, %v26_v6 }
 0x132   :  { %v51_v24 = vmul.f32 %v68_v21, %v42_v22 }
 0x133   :  { %v73_v25 = vpop.eup %72 }
 0x134   :  { %v60_v26 = vadd.f32 %v69_v23, %v51_v24  ;;  %v43_v27 = vmul.f32 %v73_v25, %v27_v10 }
 0x136   :  { %62 = vst.msk [vmem:[%s121_s3] sm:$0xff] %vm16_vm0, %v60_v26  ;;  %v52_v28 = vmul.f32 %v68_v21, %v43_v27 }
 0x138   :  { %v61_v29 = vadd.f32 %v69_v23, %v52_v28 }
 0x13a   :  { %63 = vst.msk [vmem:[%s121_s3 + $0x8] sm:$0xff] %vm16_vm0, %v61_v29 }

// kernel: encoder_forward.15
= control target key start
LH: loop header
LB: loop body
LE: loop exit
PB: predicated region body
PF: predicated region fallthrough
CT: control target
= control target key end

     0   :  { %s462_s12 = smov 0   ;;  %s495_s0 = inlined_call_operand.vmem [shape: bf16[8,8,8], index: 0, kind: input, shape index: {}]   ;;  %s496_s1 = inlined_call_operand.vmem [shape: bf16[8,8,8], index: 1, kind: input, shape index: {}]   ;;  %s497_s2 = inlined_call_operand.vmem [shape: bf16[8,8,8], index: 2, kind: input, shape index: {}]   ;;  %s498_s3 = inlined_call_operand.vmem [shape: f32[8,8,8], index: 3, kind: output, shape index: {}]  }
   0x1 LB: > { %s389_s13 = sadd.s32 4294967295, %s438_s12   ;;  %p393_p0 = scmp.ge.s32.totalorder %s438_s12, 1  ;;  %s438_s12 = sphi %s462_s12, %s13_s12  }
   0x2   : > { %p154_p1 = scmp.lt.s32.totalorder %s438_s12, 9 }
   0x4   : > { %p155_p2 = pnand %p393_p0, %p154_p1 }
   0x5   : > { %p184_p3 = scmp.lt.s32.totalorder (!%p155_p2), %s389_s13, 7 }
   0x6   : > { %158 = sbr.rel (%p155_p2) target bundleno = 731 (0x2db), region = 32 }
   0xb   : > { %v440_v0 = vmov 0.0   ;;  %vm441_vm0 = vmmov 0   ;;  %s500_s13 = smov (!%p184_p3, %s389_s13), 7  ;;  %vm204_vm1 = vcmask 64512   ;;  %vm267_vm2 = vcmask 1043456  }
   0xc   : > { %406 = vmatprep.subr.bf16.mxu0 %v440_v0  ;;  %408 = vmatprep.mubr.msk.bf16.mxu0 %vm441_vm0, %v440_v0  ;;  %s394_s14 = sshll.u32 %s500_s13, 2  ;;  %s397_s24 = sshll.u32 %s500_s13, 3 }
   0xd   : > { %412 = vmatprep.subr.bf16.mxu1 %v440_v0  ;;  %414 = vmatprep.mubr.msk.bf16.mxu1 %vm441_vm0, %v440_v0  ;;  %s191_s17 = scalar_lea.vmem %s496_s1, %s394_s14  ;;  %s187_s20 = scalar_lea.vmem %s495_s0, %s394_s14 }
   0xe   : > { %v202_v1 = vld [vmem:[%s191_s17] sm:$0xf]  ;;  %s195_s23 = scalar_lea.vmem %s497_s2, %s394_s14  ;;  %s199_s27 = scalar_lea.vmem %s498_s3, %s397_s24 }
   0xf   : > { %v209_v2 = vsel %vm204_vm1, %v202_v1, 0  ;;  %v201_v3 = vld [vmem:[%s187_s20] sm:$0xf] }
  0x10   : > { %407 = vmatpush3.bf16.xpose.msra.mxu0 %v209_v2  ;;  %v203_v15 = vld [vmem:[%s195_s23] sm:$0xf] }
  0x11   : > { %v269_v16 = vsel %vm267_vm2, %v203_v15, 0 }
  0x12   : > { %413 = vmatpush3.bf16.msra.mxu1 %v269_v16 }
  0x17   : > { %409 = vmatmul.mubr.msk.bf16.vlgmr.msra.gmra.mxu0 %vm204_vm1, %v201_v3 }
  0xd7   : > { %v245_v4 = vpop.f32.mrf.mxu0 }
  0xd8   : > { %v251_v5 = vmul.f32 0.35355338, %v245_v4 }
  0xd9   : > { %v410_v6 = vpop.f32.mrf.mxu0 }
  0xda   : > { %v252_v7 = vsel %vm204_vm1, %v251_v5, -inf }
  0xdb   : > { %253 = vmax.xlane.f32.xlu0 %v252_v7  ;;  %v248_v8 = vpop.f32.mrf.mxu0 }
  0xdd   : > { %v411_v9 = vpop.f32.mrf.mxu0 }
 0x164   : > { %v254_v10 = vpop.xlane.xlu0 %253 }
 0x165   : > { %v255_v11 = vsub.f32 %v251_v5, %v254_v10 }
 0x167   : > { %v256_v12 = vmul.f32 1.442695, %v255_v11 }
 0x169   : > { %428 = vpow2.f32 %v256_v12 }
 0x176   : > { %v429_v13 = vpop.eup %428 }
 0x177   : > { %v258_v14 = vsel %vm204_vm1, %v429_v13, 0.0 }
 0x178   : > { %259 = vadd.xlane.f32.xlu0 %v258_v14 }
 0x201   : > { %v260_v17 = vpop.xlane.xlu0 %259 }
 0x202   : > { %430 = vrcp.f32 %v260_v17 }
 0x20f   : > { %v431_v18 = vpop.eup %430 }
 0x210   : > { %v262_v19 = vmul.f32 %v431_v18, %v429_v13 }
 0x212   : > { %v263_v20 = vpack.c.bf16 %v262_v19, %v262_v19 }
 0x214   : > { %415 = vmatmul.mubr.msk.bf16.vlgmr.msra.gmra.mxu1 %vm204_vm1, %v263_v20 }
 0x2d4   : > { %v305_v21 = vpop.f32.mrf.mxu1 }
 0x2d5   : > { %311 = vst.msk [vmem:[%s199_s27] sm:$0xff] %vm204_vm1, %v305_v21 }
 0x2d6   : > { %v416_v22 = vpop.f32.mrf.mxu1 }
 0x2d8   : > { %v308_v23 = vpop.f32.mrf.mxu1 }
 0x2da   : > { %v417_v24 = vpop.f32.mrf.mxu1 }
 0x2db PF: > { %s13_s12 = sadd.s32 1, %s438_s12  }
 0x2dc   : > { %p10_p4 = scmp.ge.s32.totalorder %s13_s12, 10  }
 0x2de   :  { %12 = sbr.rel (!%p10_p4) target bundleno = 1 (0x1), region = 68 }

// kernel: encoder_forward.25
= control target key start
LH: loop header
LB: loop body
LE: loop exit
PB: predicated region body
PF: predicated region fallthrough
CT: control target
= control target key end

     0   :  { %vm17_vm0 = vcmask 261120   ;;  %s156_s0 = inlined_call_operand.vmem [shape: f32[16,32], index: 0, kind: input, shape index: {}]   ;;  %s157_s1 = inlined_call_operand.vmem [shape: f32[1,32], index: 1, kind: input, shape index: {}]   ;;  %s158_s2 = inlined_call_operand.vmem [shape: f32[1,32], index: 2, kind: input, shape index: {}]   ;;  %s159_s3 = inlined_call_operand.hbm [shape: f32[16,32], index: 3, kind: output, shape index: {}]  }
   0x1   :  { %v15_v0 = vld [vmem:[%s156_s0] sm:$0xff]  ;;  %v16_v1 = vld [vmem:[%s156_s0 + $0x8] sm:$0xff] }
   0x2   :  { %8 = vsyncpa [#allocation3], 0  ;;  %v18_v2 = vsel %vm17_vm0, %v15_v0, 0.0  ;;  %v21_v3 = vsel %vm17_vm0, %v16_v1, 0.0  ;;  %v81_v21 = vld [vmem:[%s157_s1] ss:$0 sm:$0xff] }
   0x3   :  { %19 = vadd.xlane.f32.xlu0 %v18_v2  ;;  %v82_v23 = vld [vmem:[%s158_s2] ss:$0 sm:$0xff]  ;;  %s112_s19 = smov [#allocation2]  }
   0x4   :  { %s70_s20 = sshll.u32 %s112_s19, 4  ;;  %s71_s20 = int_to_ptr.vmem [resolvable:$true] %s70_s20 }
   0x5   :  { %s90_s21 = scalar_lea.vmem %s71_s20, 256  ;;  %p95_p1 = scmp.lt.s32.totalorder %s71_s20, %s71_s20 }
   0x6   :  { %p91_p0 = scmp.ne.s32.totalorder %s71_s20, %s90_s21  ;;  %p96_p2 = scmp.lt.s32.totalorder %s90_s21, %s90_s21 }
   0x7   :  { %22 = vadd.xlane.f32.xlu0 %v21_v3 }
   0x8   :  { %p97_p3 = por %p96_p2, %p95_p1 }
   0xa   :  { %p98_p4 = pnand %p97_p3, %p91_p0 }
  0x8c   :  { %v20_v4 = vpop.xlane.xlu0 %19 }
  0x8d   :  { %v25_v5 = vmul.f32 0.03125, %v20_v4 }
  0x8f   :  { %v27_v6 = vsub.f32 %v15_v0, %v25_v5 }
  0x90   :  { %v23_v7 = vpop.xlane.xlu0 %22 }
  0x91   :  { %v26_v8 = vmul.f32 0.03125, %v23_v7  ;;  %v29_v9 = vmul.f32 %v27_v6, %v27_v6 }
  0x93   :  { %v28_v10 = vsub.f32 %v16_v1, %v26_v8  ;;  %v31_v11 = vsel %vm17_vm0, %v29_v9, 0.0 }
  0x94   :  { %32 = vadd.xlane.f32.xlu1 %v31_v11 }
  0x95   :  { %v30_v12 = vmul.f32 %v28_v10, %v28_v10 }
  0x97   :  { %v34_v13 = vsel %vm17_vm0, %v30_v12, 0.0 }
  0x98   :  { %35 = vadd.xlane.f32.xlu1 %v34_v13 }
 0x11d   :  { %v33_v14 = vpop.xlane.xlu1 %32 }
 0x11e   :  { %v37_v15 = vmul.f32 0.03125, %v33_v14 }
 0x120   :  { %v39_v16 = vadd.f32 1e-05, %v37_v15 }
 0x121   :  { %v36_v17 = vpop.xlane.xlu1 %35 }
 0x122   :  { %86 = vrsqrt.f32 %v39_v16  ;;  %v38_v18 = vmul.f32 0.03125, %v36_v17 }
 0x124   :  { %v40_v19 = vadd.f32 1e-05, %v38_v18 }
 0x126   :  { %88 = vrsqrt.f32 %v40_v19 }
 0x12f   :  { %v87_v20 = vpop.eup %86 }
 0x130   :  { %v43_v22 = vmul.f32 %v87_v20, %v27_v6 }
 0x132   :  { %v52_v24 = vmul.f32 %v81_v21, %v43_v22 }
 0x133   :  { %v89_v25 = vpop.eup %88 }
 0x134   :  { %v44_v26 = vmul.f32 %v89_v25, %v28_v10  ;;  %v61_v27 = vadd.f32 %v82_v23, %v52_v24 }
 0x136   :  { %v53_v28 = vmul.f32 %v81_v21, %v44_v26  ;;  %63 = vst.msk [vmem:[#allocation2] sm:$0xff] %vm17_vm0, %v61_v27 }
 0x138   :  { %v62_v29 = vadd.f32 %v82_v23, %v53_v28 }
 0x13a   :  { %64 = vst.msk [vmem:[#allocation2 + $0x8] sm:$0xff] %vm17_vm0, %v62_v29 }
 0x13b   :  { %101 = shalt.err (!%p98_p4)
}
 0x13c   :  { %s113_s1 = smov 128   ;;  %s114_s2 = smov 8  }
 0x13d   :  { %76 = dma.vmem_to_hbm [thread:$0]  %s71_s20, 256, %s159_s3, [#allocation3], %s113_s1, %s113_s1, %s114_s2  }
 0x13e   :  { %110 = dma.done.wait [#allocation3], 256  }
 0x13f   :  { %111 = vsyncadd [#allocation3], 4294967040 }
 0x140   :  { %80 = vsyncpa [#allocation3], 1 }

// kernel: encoder_forward.18
= control target key start
LH: loop header
LB: loop body
LE: loop exit
PB: predicated region body
PF: predicated region fallthrough
CT: control target
= control target key end

     0   :  { %v377_v0 = vmov 0.0   ;;  %vm378_vm0 = vmmov 0   ;;  %s472_s1 = inlined_call_operand.vmem [shape: bf16[128,128], index: 1, kind: input, shape index: {}]   ;;  %s473_s3 = inlined_call_operand.vmem [shape: bf16[128,128], index: 3, kind: input, shape index: {}]   ;;  %s474_s0 = inlined_call_operand.vmem [shape: bf16[16,128], index: 0, kind: input, shape index: {}]   ;;  %s475_s2 = inlined_call_operand.vmem [shape: f32[1,128], index: 2, kind: input, shape index: {}]   ;;  %s476_s4 = inlined_call_operand.vmem [shape: f32[1,128], index: 4, kind: input, shape index: {}]   ;;  %s477_s5 = inlined_call_operand.vmem [shape: f32[16,128], index: 5, kind: output, shape index: {}]  }
   0x1   :  { %318 = vmatprep.subr.bf16.mxu0 %v377_v0  ;;  %v360_v1 = vld [vmem:[%s472_s1 + $0x38] sm:$0xff]   ;;  %334 = vmatprep.mubr.msk.bf16.mxu0 %vm378_vm0, %v377_v0  ;;  %v361_v2 = vld [vmem:[%s472_s1 + $0x30] sm:$0xff]   ;;  %v362_v3 = vld [vmem:[%s472_s1 + $0x28] sm:$0xff]  }
   0x2   :  { %338 = vmatprep.subr.bf16.mxu1 %v377_v0  ;;  %354 = vmatprep.mubr.msk.bf16.mxu1 %vm378_vm0, %v377_v0  ;;  %v369_v4 = vld [vmem:[%s473_s3 + $0x38] sm:$0xff]   ;;  %v363_v5 = vld [vmem:[%s472_s1 + $0x20] sm:$0xff]   ;;  %v370_v6 = vld [vmem:[%s473_s3 + $0x30] sm:$0xff]  }
   0x3   :  { %319 = vmatpush3.bf16.msra.mxu0 %v360_v1  ;;  %339 = vmatpush3.bf16.msra.mxu1 %v369_v4  ;;  %v364_v7 = vld [vmem:[%s472_s1 + $0x18] sm:$0xff]   ;;  %v371_v8 = vld [vmem:[%s473_s3 + $0x28] sm:$0xff]   ;;  %v365_v9 = vld [vmem:[%s472_s1 + $0x10] sm:$0xff]  }
   0x4   :  { %320 = vmatprep.subr.bf16.mxu0 %v377_v0  ;;  %340 = vmatprep.subr.bf16.mxu1 %v377_v0  ;;  %v372_v10 = vld [vmem:[%s473_s3 + $0x20] sm:$0xff]   ;;  %v366_v11 = vld [vmem:[%s472_s1 + $0x8] sm:$0xff]   ;;  %v373_v12 = vld [vmem:[%s473_s3 + $0x18] sm:$0xff]  }
   0x5   :  { %v367_v13 = vld [vmem:[%s472_s1] sm:$0xff]   ;;  %v374_v15 = vld [vmem:[%s473_s3 + $0x10] sm:$0xff]   ;;  %v375_v16 = vld [vmem:[%s473_s3 + $0x8] sm:$0xff]  }
   0x6   :  { %v368_v14 = vld [vmem:[%s474_s0] sm:$0xff]  }
   0x7   :  { %321 = vmatpush3.bf16.msra.mxu0 %v361_v2  ;;  %341 = vmatpush3.bf16.msra.mxu1 %v370_v6  ;;  %v376_v17 = vld [vmem:[%s473_s3] sm:$0xff]  }
   0x8   :  { %322 = vmatprep.subr.bf16.mxu0 %v377_v0  ;;  %342 = vmatprep.subr.bf16.mxu1 %v377_v0  ;;  %v281_v18 = vld [vmem:[%s475_s2] ss:$0 sm:$0xff] }
   0x9   :  { %v299_v28 = vld [vmem:[%s476_s4] ss:$0 sm:$0xff] }
   0xb   :  { %323 = vmatpush3.bf16.msra.mxu0 %v362_v3  ;;  %343 = vmatpush3.bf16.msra.mxu1 %v371_v8 }
   0xc   :  { %324 = vmatprep.subr.bf16.mxu0 %v377_v0  ;;  %344 = vmatprep.subr.bf16.mxu1 %v377_v0 }
   0xf   :  { %325 = vmatpush3.bf16.msra.mxu0 %v363_v5  ;;  %345 = vmatpush3.bf16.msra.mxu1 %v372_v10 }
  0x10   :  { %326 = vmatprep.subr.bf16.mxu0 %v377_v0  ;;  %346 = vmatprep.subr.bf16.mxu1 %v377_v0 }
  0x13   :  { %327 = vmatpush3.bf16.msra.mxu0 %v364_v7  ;;  %347 = vmatpush3.bf16.msra.mxu1 %v373_v12 }
  0x14   :  { %328 = vmatprep.subr.bf16.mxu0 %v377_v0  ;;  %348 = vmatprep.subr.bf16.mxu1 %v377_v0 }
  0x17   :  { %329 = vmatpush3.bf16.msra.mxu0 %v365_v9  ;;  %349 = vmatpush3.bf16.msra.mxu1 %v374_v15 }
  0x18   :  { %330 = vmatprep.subr.bf16.mxu0 %v377_v0  ;;  %350 = vmatprep.subr.bf16.mxu1 %v377_v0 }
  0x1b   :  { %331 = vmatpush3.bf16.msra.mxu0 %v366_v11  ;;  %351 = vmatpush3.bf16.msra.mxu1 %v375_v16 }
  0x1c   :  { %332 = vmatprep.subr.bf16.mxu0 %v377_v0  ;;  %352 = vmatprep.subr.bf16.mxu1 %v377_v0 }
  0x1f   :  { %333 = vmatpush3.bf16.msra.mxu0 %v367_v13  ;;  %353 = vmatpush3.bf16.msra.mxu1 %v376_v17 }
  0x22   :  { %335 = vmatmul.mubr.bf16.vlgmr.msra.gmra.mxu0 %v368_v14 }
  0xe2   :  { %v140_v19 = vpop.f32.mrf.mxu0 }
  0xe3   :  { %v141_v21 = vadd.f32 %v281_v18, %v140_v19 }
  0xe4   :  { %v336_v20 = vpop.f32.mrf.mxu0 }
  0xe5   :  { %v147_v25 = vmax.f32 %v141_v21, 0.0 }
  0xe6   :  { %v143_v22 = vpop.f32.mrf.mxu0 }
  0xe7   :  { %v144_v23 = vadd.f32 %v281_v18, %v143_v22 }
  0xe8   :  { %v337_v24 = vpop.f32.mrf.mxu0 }
  0xe9   :  { %v148_v26 = vmax.f32 %v144_v23, 0.0 }
  0xeb   :  { %v151_v27 = vpack.c.bf16 %v148_v26, %v147_v25 }
  0xed   :  { %355 = vmatmul.mubr.bf16.vlgmr.msra.gmra.mxu1 %v151_v27 }
 0x1ad   :  { %v250_v29 = vpop.f32.mrf.mxu1 }
 0x1ae   :  { %v273_v30 = vadd.f32 %v299_v28, %v250_v29 }
 0x1af   :  { %v356_v31 = vpop.f32.mrf.mxu1 }
 0x1b0   :  { %275 = vst [vmem:[%s477_s5] sm:$0xff] %v273_v30 }
 0x1b1   :  { %v253_v32 = vpop.f32.mrf.mxu1 }
 0x1b2   :  { %v274_v33 = vadd.f32 %v299_v28, %v253_v32 }
 0x1b3   :  { %v357_v34 = vpop.f32.mrf.mxu1 }
 0x1b4   :  { %276 = vst [vmem:[%s477_s5 + $0x8] sm:$0xff] %v274_v33 }

</bundles_post_ra>
